<compile_context>
chip_gen: v5e
topology: v5e:2x2
jax: 0.10.0
libtpu: 0.0.40
codegen_flags: <defaults>
</compile_context>

<pallas_src>
import jax
import jax.numpy as jnp
from jax.experimental import pallas as pl
from jax.experimental.pallas import tpu as pltpu

IN_FEATURES = 348  # fixed by the module definition

_LANE = 128   # vreg lane width
_SUBLANE = 8  # f32 sublane height


def _round_up(x, m):
    return ((x + m - 1) // m) * m


def _pad2(a, rows, cols):
    return jnp.pad(a, ((0, rows - a.shape[0]), (0, cols - a.shape[1])))


def _policy_kernel(x_ref, wbig_ref, bbig_ref, wh_ref, bh_ref, out_ref):
    # Static (trace-time) padded sizes.
    hp = wbig_ref.shape[1] // 2   # padded hidden
    ap = wh_ref.shape[1] // 2     # padded action

    x = x_ref[...]

    # Fused lin1 + (folded) lin2 pre-activation: one K=KP, N=2*HP MXU push.
    y = jnp.dot(x, wbig_ref[...], preferred_element_type=jnp.float32) + bbig_ref[...]

    x_1 = jnp.maximum(y[:, :hp], 0.0)   # relu(lin1(x))
    h2 = jnp.maximum(y[:, hp:], 0.0)    # relu(lin2(lin1_pre(x)))
    h = h2 + x_1                        # residual add (padded cols stay 0)

    # Fused mean + deviation heads: one K=HP, N=2*AP MXU push.
    z = jnp.dot(h, wh_ref[...], preferred_element_type=jnp.float32) + bh_ref[...]

    # Single lane-dense output: [mean | exp(log_dev)], split at a vreg boundary.
    out_ref[:, :ap] = z[:, :ap]
    out_ref[:, ap:] = jnp.exp(z[:, ap:])


def policy_forward(x, params):
    """x: (B, 348) float32. params: dict of (in,out) weights / (1,out) biases."""
    B = x.shape[0]
    K = x.shape[1]
    hidden = params["w1"].shape[1]
    action = params["wm"].shape[1]

    # Padded sizes (lane-aligned / sublane-aligned).
    KP = _round_up(K, _LANE)
    HP = _round_up(hidden, _LANE)
    AP = _round_up(action, _LANE)

    # Batch tiling: pad to sublane multiple, tile large batches.
    Bp0 = _round_up(B, _SUBLANE)
    TB = min(512, Bp0)
    Bp = _round_up(B, TB)

    f32 = jnp.float32
    w1 = params["w1"].astype(f32)   # (K, H)
    b1 = params["b1"].astype(f32)   # (1, H)
    w2 = params["w2"].astype(f32)   # (H, H)
    b2 = params["b2"].astype(f32)   # (1, H)
    wm = params["wm"].astype(f32)   # (H, A)
    bm = params["bm"].astype(f32)   # (1, A)
    wd = params["wd"].astype(f32)   # (H, A)
    bd = params["bd"].astype(f32)   # (1, A)

    # ---- algebraic folding of lin2 into lin1 (done once, outside the kernel)
    w12 = w1 @ w2                   # (K, H)
    b12 = b1 @ w2 + b2              # (1, H)

    w_big = jnp.concatenate([_pad2(w1, KP, HP), _pad2(w12, KP, HP)], axis=1)   # (KP, 2HP)
    b_big = jnp.concatenate([_pad2(b1, 1, HP), _pad2(b12, 1, HP)], axis=1)     # (1, 2HP)

    # ---- fused heads
    w_heads = jnp.concatenate([_pad2(wm, HP, AP), _pad2(wd, HP, AP)], axis=1)  # (HP, 2AP)
    b_heads = jnp.concatenate([_pad2(bm, 1, AP), _pad2(bd, 1, AP)], axis=1)    # (1, 2AP)

    # ---- padded input
    x_pad = _pad2(x.astype(f32), Bp, KP)                                       # (Bp, KP)

    grid = (Bp // TB,)

    in_specs = [
        pl.BlockSpec((TB, KP), lambda i: (i, 0)),        # x tile (pipelined)
        pl.BlockSpec((KP, 2 * HP), lambda i: (0, 0)),    # fused W1|W1@W2 (resident)
        pl.BlockSpec((1, 2 * HP), lambda i: (0, 0)),
        pl.BlockSpec((HP, 2 * AP), lambda i: (0, 0)),    # fused heads (resident)
        pl.BlockSpec((1, 2 * AP), lambda i: (0, 0)),
    ]
    out_spec = pl.BlockSpec((TB, 2 * AP), lambda i: (i, 0))

    flops = 2 * Bp * KP * (2 * HP) + 2 * Bp * HP * (2 * AP)
    bytes_accessed = 4 * (
        Bp * KP + KP * 2 * HP + 2 * HP + HP * 2 * AP + 2 * AP + Bp * 2 * AP
    )
    cost = pl.CostEstimate(
        flops=flops,
        transcendentals=Bp * AP,
        bytes_accessed=bytes_accessed,
    )

    out = pl.pallas_call(
        _policy_kernel,
        grid=grid,
        in_specs=in_specs,
        out_specs=out_spec,
        out_shape=jax.ShapeDtypeStruct((Bp, 2 * AP), f32),
        compiler_params=pltpu.CompilerParams(
            dimension_semantics=("parallel",),
        ),
        cost_estimate=cost,
    )(x_pad, w_big, b_big, w_heads, b_heads)

    mean = out[:B, :action]
    std = out[:B, AP:AP + action]
    return mean, std


def init_policy_params(key, hidden_size, action_size):
    """Deterministic PyTorch-Linear-style init (uniform +/- 1/sqrt(fan_in)).

    Weights are stored already transposed to (in, out); biases are (1, out)."""
    def linear(k, fan_in, fan_out):
        kw, kb = jax.random.split(k)
        bound = 1.0 / jnp.sqrt(jnp.float32(fan_in))
        w = jax.random.uniform(kw, (fan_in, fan_out), jnp.float32, -bound, bound)
        b = jax.random.uniform(kb, (1, fan_out), jnp.float32, -bound, bound)
        return w, b

    k1, k2, k3, k4 = jax.random.split(key, 4)
    w1, b1 = linear(k1, IN_FEATURES, hidden_size)
    w2, b2 = linear(k2, hidden_size, hidden_size)
    wd, bd = linear(k3, hidden_size, action_size)   # deviation head
    wm, bm = linear(k4, hidden_size, action_size)   # mean head
    return {"w1": w1, "b1": b1, "w2": w2, "b2": b2,
            "wm": wm, "bm": bm, "wd": wd, "bd": bd}


def policy_reference(x, p):
    """Pure-JAX reference (unfused, unpadded) for correctness check."""
    h1 = x @ p["w1"] + p["b1"]
    x_1 = jnp.maximum(h1, 0.0)
    h2 = jnp.maximum(h1 @ p["w2"] + p["b2"], 0.0)
    h = h2 + x_1
    mean = h @ p["wm"] + p["bm"]
    std = jnp.exp(h @ p["wd"] + p["bd"])
    return mean, std


# TODO(synk): get_action (normal sampling + tanh squash) is host-side policy
# logic in the original module and is not part of this forward kernel.

if __name__ == "__main__":
    key = jax.random.PRNGKey(0)
    k_params, k_x = jax.random.split(key)

    batch = 2
    hidden_size = 32
    action_size = 8

    params = init_policy_params(k_params, hidden_size, action_size)
    x = jax.random.normal(k_x, (batch, IN_FEATURES), jnp.float32)

    mean, std = policy_forward(x, params)
    jax.block_until_ready((mean, std))

    mean_ref, std_ref = policy_reference(x, params)
    assert mean.shape == (batch, action_size) and std.shape == (batch, action_size)
    # Folding (x@W1)@W2 -> x@(W1@W2) reassociates f32 sums; allow ~1e-4.
    assert jnp.allclose(mean, mean_ref, atol=1e-4, rtol=1e-4)
    assert jnp.allclose(std, std_ref, atol=1e-4, rtol=1e-4)
    assert bool(jnp.all(std > 0.0))

    print("KERNEL_OK")
</pallas_src>

<mosaic_0001>
module attributes {stable_mosaic.version = 11 : i64} {
  func.func @_policy_kernel(%arg0: i32, %arg1: memref<8x384xf32, #tpu.memory_space<vmem>>, %arg2: memref<384x256xf32, #tpu.memory_space<vmem>>, %arg3: memref<1x256xf32, #tpu.memory_space<vmem>>, %arg4: memref<128x256xf32, #tpu.memory_space<vmem>>, %arg5: memref<1x256xf32, #tpu.memory_space<vmem>>, %arg6: memref<8x256xf32, #tpu.memory_space<vmem>>) attributes {dimension_semantics = [#tpu.dimension_semantics<parallel>], iteration_bounds = array<i64: 1>, scalar_prefetch = 0 : i64, scratch_operands = 0 : i64, tpu.core_type = #tpu.core_type<tc>, window_params = [{transform_indices = @transform_0, window_bounds = array<i64: 8, 384>}, {pipeline_mode = #tpu.pipeline_mode<synchronous>, transform_indices = @transform_1, window_bounds = array<i64: 384, 256>}, {pipeline_mode = #tpu.pipeline_mode<synchronous>, transform_indices = @transform_2, window_bounds = array<i64: 1, 256>}, {pipeline_mode = #tpu.pipeline_mode<synchronous>, transform_indices = @transform_3, window_bounds = array<i64: 128, 256>}, {pipeline_mode = #tpu.pipeline_mode<synchronous>, transform_indices = @transform_4, window_bounds = array<i64: 1, 256>}, {transform_indices = @transform_5, window_bounds = array<i64: 8, 256>}]} {
    %c0 = arith.constant 0 : index
    %c0_0 = arith.constant 0 : index
    %0 = vector.load %arg1[%c0, %c0_0] : memref<8x384xf32, #tpu.memory_space<vmem>>, vector<8x384xf32>
    %c0_1 = arith.constant 0 : index
    %c0_2 = arith.constant 0 : index
    %1 = vector.load %arg2[%c0_1, %c0_2] : memref<384x256xf32, #tpu.memory_space<vmem>>, vector<384x256xf32>
    %cst = arith.constant dense<0.000000e+00> : vector<8x256xf32>
    %2 = tpu.matmul %0, %1, %cst {dimension_numbers = #tpu.dot_dimension_numbers<[1], [0], [0], [1], [0, 0, 1, 1], [], []>} : vector<8x384xf32>, vector<384x256xf32>, vector<8x256xf32> -> vector<8x256xf32>
    %c0_3 = arith.constant 0 : index
    %c0_4 = arith.constant 0 : index
    %3 = vector.load %arg3[%c0_3, %c0_4] : memref<1x256xf32, #tpu.memory_space<vmem>>, vector<1x256xf32>
    %4 = vector.broadcast %3 : vector<1x256xf32> to vector<8x256xf32>
    %5 = arith.addf %2, %4 : vector<8x256xf32>
    %6 = vector.extract_strided_slice %5 {offsets = [0, 0], sizes = [8, 128], strides = [1, 1]} : vector<8x256xf32> to vector<8x128xf32>
    %cst_5 = arith.constant 0.000000e+00 : f32
    %7 = vector.broadcast %cst_5 : f32 to vector<8x128xf32>
    %8 = arith.maximumf %6, %7 : vector<8x128xf32>
    %9 = vector.extract_strided_slice %5 {offsets = [0, 128], sizes = [8, 128], strides = [1, 1]} : vector<8x256xf32> to vector<8x128xf32>
    %cst_6 = arith.constant 0.000000e+00 : f32
    %10 = vector.broadcast %cst_6 : f32 to vector<8x128xf32>
    %11 = arith.maximumf %9, %10 : vector<8x128xf32>
    %12 = arith.addf %11, %8 : vector<8x128xf32>
    %c0_7 = arith.constant 0 : index
    %c0_8 = arith.constant 0 : index
    %13 = vector.load %arg4[%c0_7, %c0_8] : memref<128x256xf32, #tpu.memory_space<vmem>>, vector<128x256xf32>
    %cst_9 = arith.constant dense<0.000000e+00> : vector<8x256xf32>
    %14 = tpu.matmul %12, %13, %cst_9 {dimension_numbers = #tpu.dot_dimension_numbers<[1], [0], [0], [1], [0, 0, 1, 1], [], []>} : vector<8x128xf32>, vector<128x256xf32>, vector<8x256xf32> -> vector<8x256xf32>
    %c0_10 = arith.constant 0 : index
    %c0_11 = arith.constant 0 : index
    %15 = vector.load %arg5[%c0_10, %c0_11] : memref<1x256xf32, #tpu.memory_space<vmem>>, vector<1x256xf32>
    %16 = vector.broadcast %15 : vector<1x256xf32> to vector<8x256xf32>
    %17 = arith.addf %14, %16 : vector<8x256xf32>
    %18 = vector.extract_strided_slice %17 {offsets = [0, 0], sizes = [8, 128], strides = [1, 1]} : vector<8x256xf32> to vector<8x128xf32>
    %c0_12 = arith.constant 0 : index
    %c0_13 = arith.constant 0 : index
    %19 = vector.load %arg6[%c0_12, %c0_13] : memref<8x256xf32, #tpu.memory_space<vmem>>, vector<8x128xf32>
    tpu.vector_store %arg6[%c0_12, %c0_13], %18 {strides = array<i32>} : memref<8x256xf32, #tpu.memory_space<vmem>>, vector<8x128xf32>,
    %20 = vector.extract_strided_slice %17 {offsets = [0, 128], sizes = [8, 128], strides = [1, 1]} : vector<8x256xf32> to vector<8x128xf32>
    %21 = math.exp %20 : vector<8x128xf32>
    %c0_14 = arith.constant 0 : index
    %c128 = arith.constant 128 : index
    %22 = vector.load %arg6[%c0_14, %c128] : memref<8x256xf32, #tpu.memory_space<vmem>>, vector<8x128xf32>
    tpu.vector_store %arg6[%c0_14, %c128], %21 {strides = array<i32>} : memref<8x256xf32, #tpu.memory_space<vmem>>, vector<8x128xf32>,
    return
  }
  func.func @transform_0(%arg0: i32) -> (i32, i32) {
    %c0_i32 = arith.constant 0 : i32
    %c0_i32_0 = arith.constant 0 : i32
    return %arg0, %c0_i32 : i32, i32
  }
  func.func @transform_1(%arg0: i32) -> (i32, i32) {
    %c0_i32 = arith.constant 0 : i32
    %c0_i32_0 = arith.constant 0 : i32
    %c0_i32_1 = arith.constant 0 : i32
    return %c0_i32, %c0_i32_0 : i32, i32
  }
  func.func @transform_2(%arg0: i32) -> (i32, i32) {
    %c0_i32 = arith.constant 0 : i32
    %c0_i32_0 = arith.constant 0 : i32
    %c0_i32_1 = arith.constant 0 : i32
    return %c0_i32, %c0_i32_0 : i32, i32
  }
  func.func @transform_3(%arg0: i32) -> (i32, i32) {
    %c0_i32 = arith.constant 0 : i32
    %c0_i32_0 = arith.constant 0 : i32
    %c0_i32_1 = arith.constant 0 : i32
    return %c0_i32, %c0_i32_0 : i32, i32
  }
  func.func @transform_4(%arg0: i32) -> (i32, i32) {
    %c0_i32 = arith.constant 0 : i32
    %c0_i32_0 = arith.constant 0 : i32
    %c0_i32_1 = arith.constant 0 : i32
    return %c0_i32, %c0_i32_0 : i32, i32
  }
  func.func @transform_5(%arg0: i32) -> (i32, i32) {
    %c0_i32 = arith.constant 0 : i32
    %c0_i32_0 = arith.constant 0 : i32
    return %arg0, %c0_i32 : i32, i32
  }
}

</mosaic_0001>

<bundles_post_ra>
// kernel: tpu_custom_call.1
= control target key start
LH: loop header
LB: loop body
LE: loop exit
PB: predicated region body
PF: predicated region fallthrough
CT: control target
= control target key end

     0   :  { %10 = vsyncpa [#allocation3], 0  ;;  %s609_s0 = inlined_call_operand.hbm [shape: f32[8,384], index: 0, kind: input, shape index: {}]   ;;  %s610_s1 = inlined_call_operand.hbm [shape: f32[384,256], index: 1, kind: input, shape index: {}]   ;;  %s611_s2 = inlined_call_operand.hbm [shape: f32[1,256], index: 2, kind: input, shape index: {}]   ;;  %s612_s3 = inlined_call_operand.hbm [shape: f32[128,256], index: 3, kind: input, shape index: {}]   ;;  %s613_s4 = inlined_call_operand.vmem [shape: f32[1,256], index: 4, kind: input, shape index: {}]   ;;  %s614_s5 = inlined_call_operand.hbm [shape: f32[8,256], index: 5, kind: output, shape index: {}]  }
   0x1   :  { %11 = vsyncpa [#allocation6], 0 }
   0x2   :  { %12 = vsyncpa [#allocation9], 0  ;;  %s29_s20 = sshll.u32 %s610_s1, 4  ;;  %s30_s20 = int_to_ptr.hbm [resolvable:$true] %s29_s20 }
   0x3   :  { %13 = vsyncpa [#allocation4], 0  ;;  %s546_s21 = smov [#allocation5]   ;;  %s19_s25 = sshll.u32 %s609_s0, 4  ;;  %s20_s25 = int_to_ptr.hbm [resolvable:$true] %s19_s25 }
   0x4   :  { %s31_s22 = sshll.u32 %s546_s21, 4  ;;  %s547_s26 = smov 256   ;;  %s32_s22 = int_to_ptr.vmem [resolvable:$true] %s31_s22 }
   0x5   :  { %s548_s27 = smov 16   ;;  %s549_s28 = smov [#allocation2]  }
   0x6   :  { %37 = dma.hbm_to_vmem [thread:$0]  %s30_s20, 12288, %s32_s22, [#allocation6], %s547_s26, %s547_s26, %s548_s27  }
   0x7   :  { %s21_s29 = sshll.u32 %s549_s28, 4  ;;  %s43_s7 = sshll.u32 %s611_s2, 4  ;;  %s22_s29 = int_to_ptr.vmem [resolvable:$true] %s21_s29  ;;  %s44_s7 = int_to_ptr.hbm [resolvable:$true] %s43_s7 }
   0x8   :  { %24 = dma.hbm_to_vmem [thread:$0]  %s20_s25, 384, %s22_s29, [#allocation3]  }
   0x9   :  { %s53_s9 = sshll.u32 %s612_s3, 4  ;;  %s550_s10 = smov [#allocation7]   ;;  %s54_s9 = int_to_ptr.hbm [resolvable:$true] %s53_s9 }
   0xa   :  { %s45_s11 = sshll.u32 %s550_s10, 4  ;;  %s551_s0 = smov [#allocation8]   ;;  %s46_s11 = int_to_ptr.vmem [resolvable:$true] %s45_s11 }
   0xb   :  { %48 = dma.hbm_to_vmem [thread:$0]  %s44_s7, 32, %s46_s11, [#allocation6]  }
   0xc   :  { %s55_s12 = sshll.u32 %s551_s0, 4  ;;  %s56_s12 = int_to_ptr.vmem [resolvable:$true] %s55_s12 }
   0xd   :  { %61 = dma.hbm_to_vmem [thread:$0]  %s54_s9, 4096, %s56_s12, [#allocation9], %s547_s26, %s547_s26, %s548_s27  }
   0xe   :  { %538 = dma.done.wait [#allocation3], 384  }
   0xf   :  { %539 = vsyncadd [#allocation3], 4294966912 }
  0x10   :  { %540 = dma.done.wait [#allocation6], 12320  }
  0x11   :  { %541 = vsyncadd [#allocation6], 4294954976 }
  0x12   :  { %542 = dma.done.wait [#allocation9], 4096  }
  0x13   :  { %543 = vsyncadd [#allocation9], 4294963200  ;;  %v113_v0 = vld [vmem:[#allocation5 + $0xf0] sm:$0xff]  ;;  %v111_v1 = vld [vmem:[#allocation5 + $0xe0] sm:$0xff]  ;;  %s552_s13 = smov [#allocation10]   ;;  %s397_s17 = sshll.u32 %s614_s5, 4  ;;  %s398_s17 = int_to_ptr.hbm [resolvable:$true] %s397_s17 }
  0x14   :  { %v145_v2 = vld [vmem:[#allocation5 + $0x1f0] sm:$0xff]  ;;  %185 = vmatpush.msra.mxu0 %v113_v0  ;;  %v143_v3 = vld [vmem:[#allocation5 + $0x1e0] sm:$0xff]  ;;  %v114_v14 = vld [vmem:[#allocation5 + $0xf8] sm:$0xff]  ;;  %s395_s14 = sshll.u32 %s552_s13, 4  ;;  %s396_s14 = int_to_ptr.vmem [resolvable:$true] %s395_s14 }
  0x15   :  { %205 = vmatpush.msra.mxu1 %v145_v2  ;;  %v109_v4 = vld [vmem:[#allocation5 + $0xd0] sm:$0xff]  ;;  %v107_v6 = vld [vmem:[#allocation5 + $0xc0] sm:$0xff]  ;;  %v112_v16 = vld [vmem:[#allocation5 + $0xe8] sm:$0xff]  ;;  %245 = vmatpush.msra.mxu3 %v114_v14 }
  0x16   :  { %v141_v5 = vld [vmem:[#allocation5 + $0x1d0] sm:$0xff]  ;;  %186 = vmatpush.msra.mxu0 %v111_v1  ;;  %v139_v7 = vld [vmem:[#allocation5 + $0x1c0] sm:$0xff]  ;;  %v110_v20 = vld [vmem:[#allocation5 + $0xd8] sm:$0xff] }
  0x17   :  { %206 = vmatpush.msra.mxu1 %v143_v3  ;;  %v105_v8 = vld [vmem:[#allocation5 + $0xb0] sm:$0xff]  ;;  %v103_v10 = vld [vmem:[#allocation5 + $0xa0] sm:$0xff]  ;;  %246 = vmatpush.msra.mxu3 %v112_v16  ;;  %v108_v24 = vld [vmem:[#allocation5 + $0xc8] sm:$0xff] }
  0x18   :  { %187 = vmatpush.msra.mxu0 %v109_v4  ;;  %v137_v9 = vld [vmem:[#allocation5 + $0x1b0] sm:$0xff]  ;;  %v135_v12 = vld [vmem:[#allocation5 + $0x1a0] sm:$0xff]  ;;  %v106_v28 = vld [vmem:[#allocation5 + $0xb8] sm:$0xff] }
  0x19   :  { %207 = vmatpush.msra.mxu1 %v141_v5  ;;  %v177_v11 = vld [vmem:[#allocation5 + $0x2f0] sm:$0xff]  ;;  %v175_v13 = vld [vmem:[#allocation5 + $0x2e0] sm:$0xff]  ;;  %247 = vmatpush.msra.mxu3 %v110_v20  ;;  %v104_v32 = vld [vmem:[#allocation5 + $0xa8] sm:$0xff] }
  0x1a   :  { %188 = vmatpush.msra.mxu0 %v107_v6  ;;  %225 = vmatpush.msra.mxu2 %v177_v11  ;;  %v173_v15 = vld [vmem:[#allocation5 + $0x2d0] sm:$0xff]  ;;  %v171_v19 = vld [vmem:[#allocation5 + $0x2c0] sm:$0xff]  ;;  %v102_v36 = vld [vmem:[#allocation5 + $0x98] sm:$0xff] }
  0x1b   :  { %208 = vmatpush.msra.mxu1 %v139_v7  ;;  %v101_v17 = vld [vmem:[#allocation5 + $0x90] sm:$0xff]  ;;  %v99_v21 = vld [vmem:[#allocation5 + $0x80] sm:$0xff]  ;;  %248 = vmatpush.msra.mxu3 %v108_v24  ;;  %v100_v40 = vld [vmem:[#allocation5 + $0x88] sm:$0xff] }
  0x1c   :  { %189 = vmatpush.msra.mxu0 %v105_v8  ;;  %v133_v18 = vld [vmem:[#allocation5 + $0x190] sm:$0xff]  ;;  %226 = vmatpush.msra.mxu2 %v175_v13  ;;  %v131_v22 = vld [vmem:[#allocation5 + $0x180] sm:$0xff]  ;;  %v98_v44 = vld [vmem:[#allocation5 + $0x78] sm:$0xff] }
  0x1d   :  { %209 = vmatpush.msra.mxu1 %v137_v9  ;;  %v169_v23 = vld [vmem:[#allocation5 + $0x2b0] sm:$0xff]  ;;  %v167_v27 = vld [vmem:[#allocation5 + $0x2a0] sm:$0xff]  ;;  %249 = vmatpush.msra.mxu3 %v106_v28  ;;  %v96_v48 = vld [vmem:[#allocation5 + $0x68] sm:$0xff] }
  0x1e   :  { %190 = vmatpush.msra.mxu0 %v103_v10  ;;  %227 = vmatpush.msra.mxu2 %v173_v15  ;;  %v97_v25 = vld [vmem:[#allocation5 + $0x70] sm:$0xff]  ;;  %v95_v29 = vld [vmem:[#allocation5 + $0x60] sm:$0xff]  ;;  %v94_v52 = vld [vmem:[#allocation5 + $0x58] sm:$0xff] }
  0x1f   :  { %210 = vmatpush.msra.mxu1 %v135_v12  ;;  %v129_v26 = vld [vmem:[#allocation5 + $0x170] sm:$0xff]  ;;  %v127_v30 = vld [vmem:[#allocation5 + $0x160] sm:$0xff]  ;;  %250 = vmatpush.msra.mxu3 %v104_v32  ;;  %v146_v55 = vld [vmem:[#allocation5 + $0x1f8] sm:$0xff] }
  0x20   :  { %191 = vmatpush.msra.mxu0 %v101_v17  ;;  %228 = vmatpush.msra.mxu2 %v171_v19  ;;  %v165_v31 = vld [vmem:[#allocation5 + $0x290] sm:$0xff]  ;;  %v163_v35 = vld [vmem:[#allocation5 + $0x280] sm:$0xff]  ;;  %v178_v56 = vld [vmem:[#allocation5 + $0x2f8] sm:$0xff] }
  0x21   :  { %211 = vmatpush.msra.mxu1 %v133_v18  ;;  %v93_v33 = vld [vmem:[#allocation5 + $0x50] sm:$0xff]  ;;  %v91_v37 = vld [vmem:[#allocation5 + $0x40] sm:$0xff]  ;;  %251 = vmatpush.msra.mxu3 %v102_v36  ;;  %v92_v58 = vld [vmem:[#allocation5 + $0x48] sm:$0xff] }
  0x22   :  { %192 = vmatpush.msra.mxu0 %v99_v21  ;;  %229 = vmatpush.msra.mxu2 %v169_v23  ;;  %v125_v34 = vld [vmem:[#allocation5 + $0x150] sm:$0xff]  ;;  %v123_v38 = vld [vmem:[#allocation5 + $0x140] sm:$0xff]  ;;  %v144_v59 = vld [vmem:[#allocation5 + $0x1e8] sm:$0xff] }
  0x23   :  { %212 = vmatpush.msra.mxu1 %v131_v22  ;;  %v161_v39 = vld [vmem:[#allocation5 + $0x270] sm:$0xff]  ;;  %v159_v43 = vld [vmem:[#allocation5 + $0x260] sm:$0xff]  ;;  %252 = vmatpush.msra.mxu3 %v100_v40  ;;  %v176_v60 = vld [vmem:[#allocation5 + $0x2e8] sm:$0xff] }
  0x24   :  { %193 = vmatpush.msra.mxu0 %v97_v25  ;;  %230 = vmatpush.msra.mxu2 %v167_v27  ;;  %v89_v41 = vld [vmem:[#allocation5 + $0x30] sm:$0xff]  ;;  %v87_v45 = vld [vmem:[#allocation5 + $0x20] sm:$0xff]  ;;  %v90_v62 = vld [vmem:[#allocation5 + $0x38] sm:$0xff] }
  0x25   :  { %213 = vmatpush.msra.mxu1 %v129_v26  ;;  %v121_v42 = vld [vmem:[#allocation5 + $0x130] sm:$0xff]  ;;  %v119_v46 = vld [vmem:[#allocation5 + $0x120] sm:$0xff]  ;;  %253 = vmatpush.msra.mxu3 %v98_v44  ;;  %v142_v63 = vld [vmem:[#allocation5 + $0x1d8] sm:$0xff] }
  0x26   :  { %194 = vmatpush.msra.mxu0 %v95_v29  ;;  %231 = vmatpush.msra.mxu2 %v165_v31  ;;  %v157_v47 = vld [vmem:[#allocation5 + $0x250] sm:$0xff]  ;;  %v155_v51 = vld [vmem:[#allocation5 + $0x240] sm:$0xff]  ;;  %v174_v0 = vld [vmem:[#allocation5 + $0x2d8] sm:$0xff] }
  0x27   :  { %214 = vmatpush.msra.mxu1 %v127_v30  ;;  %v85_v49 = vld [vmem:[#allocation5 + $0x10] sm:$0xff]  ;;  %v83_v53 = vld [vmem:[#allocation5] sm:$0xff]  ;;  %254 = vmatpush.msra.mxu3 %v96_v48  ;;  %v88_v2 = vld [vmem:[#allocation5 + $0x28] sm:$0xff] }
  0x28   :  { %195 = vmatpush.msra.mxu0 %v93_v33  ;;  %232 = vmatpush.msra.mxu2 %v163_v35  ;;  %v117_v50 = vld [vmem:[#allocation5 + $0x110] sm:$0xff]  ;;  %v115_v54 = vld [vmem:[#allocation5 + $0x100] sm:$0xff]  ;;  %v140_v3 = vld [vmem:[#allocation5 + $0x1c8] sm:$0xff] }
  0x29   :  { %215 = vmatpush.msra.mxu1 %v125_v34  ;;  %255 = vmatpush.msra.mxu3 %v94_v52  ;;  %v153_v57 = vld [vmem:[#allocation5 + $0x230] sm:$0xff]  ;;  %v151_v61 = vld [vmem:[#allocation5 + $0x220] sm:$0xff]  ;;  %v172_v4 = vld [vmem:[#allocation5 + $0x2c8] sm:$0xff] }
  0x2a   :  { %196 = vmatpush.msra.mxu0 %v91_v37  ;;  %233 = vmatpush.msra.mxu2 %v161_v39  ;;  %v149_v1 = vld [vmem:[#allocation5 + $0x210] sm:$0xff]  ;;  %v147_v5 = vld [vmem:[#allocation5 + $0x200] sm:$0xff]  ;;  %v86_v6 = vld [vmem:[#allocation5 + $0x18] sm:$0xff] }
  0x2b   :  { %216 = vmatpush.msra.mxu1 %v123_v38  ;;  %256 = vmatpush.msra.mxu3 %v92_v58  ;;  %v138_v7 = vld [vmem:[#allocation5 + $0x1b8] sm:$0xff]  ;;  %v84_v10 = vld [vmem:[#allocation5 + $0x8] sm:$0xff]  ;;  %v598_v16 = vld [vmem:[#allocation2 + $0x8] sm:$0xff] }
  0x2c   :  { %197 = vmatpush.msra.mxu0 %v89_v41  ;;  %234 = vmatpush.msra.mxu2 %v159_v43  ;;  %v170_v8 = vld [vmem:[#allocation5 + $0x2b8] sm:$0xff]  ;;  %v136_v11 = vld [vmem:[#allocation5 + $0x1a8] sm:$0xff] }
  0x2d   :  { %217 = vmatpush.msra.mxu1 %v121_v42  ;;  %257 = vmatpush.msra.mxu3 %v90_v62  ;;  %v595_v9 = vld [vmem:[#allocation2 + $0x10] sm:$0xff]  ;;  %v168_v12 = vld [vmem:[#allocation5 + $0x2a8] sm:$0xff] }
  0x2e   :  { %198 = vmatpush.msra.mxu0 %v87_v45  ;;  %235 = vmatpush.msra.mxu2 %v157_v47  ;;  %v80_v13 = vld [vmem:[#allocation2] sm:$0xff]  ;;  %v134_v14 = vld [vmem:[#allocation5 + $0x198] sm:$0xff] }
  0x2f   :  { %218 = vmatpush.msra.mxu1 %v119_v46  ;;  %258 = vmatpush.msra.mxu3 %v88_v2  ;;  %v166_v15 = vld [vmem:[#allocation5 + $0x298] sm:$0xff]  ;;  %v132_v18 = vld [vmem:[#allocation5 + $0x188] sm:$0xff] }
  0x30   :  { %199 = vmatpush.msra.mxu0 %v85_v49  ;;  %236 = vmatpush.msra.mxu2 %v155_v51  ;;  %v338_v17 = vld [vmem:[#allocation8 + $0xf0] sm:$0xff]  ;;  %v164_v19 = vld [vmem:[#allocation5 + $0x288] sm:$0xff]  ;;  %v339_v20 = vld [vmem:[#allocation8 + $0xf8] sm:$0xff] }
  0x31   :  { %219 = vmatpush.msra.mxu1 %v117_v50  ;;  %259 = vmatpush.msra.mxu3 %v86_v6  ;;  %v336_v21 = vld [vmem:[#allocation8 + $0xe0] sm:$0xff]  ;;  %v130_v22 = vld [vmem:[#allocation5 + $0x178] sm:$0xff]  ;;  %v337_v24 = vld [vmem:[#allocation8 + $0xe8] sm:$0xff] }
  0x32   :  { %200 = vmatpush.msra.mxu0 %v83_v53  ;;  %237 = vmatpush.msra.mxu2 %v153_v57  ;;  %v162_v23 = vld [vmem:[#allocation5 + $0x278] sm:$0xff]  ;;  %v128_v26 = vld [vmem:[#allocation5 + $0x168] sm:$0xff] }
  0x33   :  { %220 = vmatpush.msra.mxu1 %v115_v54  ;;  %260 = vmatpush.msra.mxu3 %v84_v10  ;;  %v334_v25 = vld [vmem:[#allocation8 + $0xd0] sm:$0xff]  ;;  %v160_v27 = vld [vmem:[#allocation5 + $0x268] sm:$0xff]  ;;  %v335_v28 = vld [vmem:[#allocation8 + $0xd8] sm:$0xff] }
  0x34   :  { %265 = vmatpush.msrb.mxu0 %v146_v55  ;;  %238 = vmatpush.msra.mxu2 %v151_v61  ;;  %v332_v29 = vld [vmem:[#allocation8 + $0xc0] sm:$0xff]  ;;  %v126_v30 = vld [vmem:[#allocation5 + $0x158] sm:$0xff]  ;;  %v333_v32 = vld [vmem:[#allocation8 + $0xc8] sm:$0xff] }
  0x35   :  { %285 = vmatpush.msrb.mxu1 %v178_v56  ;;  %201 = vmatmul.f32.vlgmr.msra.gmra.mxu0 %v80_v13  ;;  %v158_v31 = vld [vmem:[#allocation5 + $0x258] sm:$0xff]  ;;  %v124_v34 = vld [vmem:[#allocation5 + $0x148] sm:$0xff] }
  0x36   :  { %266 = vmatpush.msrb.mxu0 %v144_v59  ;;  %239 = vmatpush.msra.mxu2 %v149_v1  ;;  %v330_v33 = vld [vmem:[#allocation8 + $0xb0] sm:$0xff]  ;;  %v156_v35 = vld [vmem:[#allocation5 + $0x248] sm:$0xff]  ;;  %v331_v36 = vld [vmem:[#allocation8 + $0xb8] sm:$0xff] }
  0x37   :  { %286 = vmatpush.msrb.mxu1 %v176_v60  ;;  %261 = vmatmul.f32.vlgmr.msra.gmra.mxu3 %v80_v13  ;;  %v328_v37 = vld [vmem:[#allocation8 + $0xa0] sm:$0xff]  ;;  %v122_v38 = vld [vmem:[#allocation5 + $0x138] sm:$0xff]  ;;  %v329_v40 = vld [vmem:[#allocation8 + $0xa8] sm:$0xff] }
  0x38   :  { %267 = vmatpush.msrb.mxu0 %v142_v63  ;;  %240 = vmatpush.msra.mxu2 %v147_v5  ;;  %v154_v39 = vld [vmem:[#allocation5 + $0x238] sm:$0xff]  ;;  %v120_v42 = vld [vmem:[#allocation5 + $0x128] sm:$0xff] }
  0x39   :  { %287 = vmatpush.msrb.mxu1 %v174_v0  ;;  %241 = vmatmul.f32.vlgmr.msra.gmra.mxu2 %v595_v9  ;;  %v326_v41 = vld [vmem:[#allocation8 + $0x90] sm:$0xff]  ;;  %v152_v43 = vld [vmem:[#allocation5 + $0x228] sm:$0xff]  ;;  %v327_v44 = vld [vmem:[#allocation8 + $0x98] sm:$0xff] }
  0x3a   :  { %268 = vmatpush.msrb.mxu0 %v140_v3  ;;  %221 = vmatmul.f32.vlgmr.msra.gmra.mxu1 %v598_v16  ;;  %v118_v45 = vld [vmem:[#allocation5 + $0x118] sm:$0xff]  ;;  %v116_v47 = vld [vmem:[#allocation5 + $0x108] sm:$0xff]  ;;  %v179_v3 = vld [vmem:[#allocation7] sm:$0x3] }
  0x3b   :  { %288 = vmatpush.msrb.mxu1 %v172_v4  ;;  %346 = vmatpush.msrb.mxu2 %v338_v17  ;;  %v150_v46 = vld [vmem:[#allocation5 + $0x218] sm:$0xff]  ;;  %v148_v48 = vld [vmem:[#allocation5 + $0x208] sm:$0xff]  ;;  %v181_v4 = vperm.slane %v179_v3, 0 }
  0x3c   :  { %269 = vmatpush.msrb.mxu0 %v138_v7  ;;  %366 = vmatpush.msrb.mxu3 %v339_v20  ;;  %v324_v49 = vld [vmem:[#allocation8 + $0x80] sm:$0xff]  ;;  %v325_v50 = vld [vmem:[#allocation8 + $0x88] sm:$0xff]  ;;  %v322_v51 = vld [vmem:[#allocation8 + $0x70] sm:$0xff] }
  0x3d   :  { %289 = vmatpush.msrb.mxu1 %v170_v8  ;;  %347 = vmatpush.msrb.mxu2 %v336_v21  ;;  %v323_v52 = vld [vmem:[#allocation8 + $0x78] sm:$0xff]  ;;  %v320_v53 = vld [vmem:[#allocation8 + $0x60] sm:$0xff]  ;;  %v321_v54 = vld [vmem:[#allocation8 + $0x68] sm:$0xff]  ;;  %v182_v8 = vperm.slane %v179_v3, 1 }
  0x3e   :  { %270 = vmatpush.msrb.mxu0 %v136_v11  ;;  %367 = vmatpush.msrb.mxu3 %v337_v24  ;;  %v318_v55 = vld [vmem:[#allocation8 + $0x50] sm:$0xff]  ;;  %v319_v56 = vld [vmem:[#allocation8 + $0x58] sm:$0xff]  ;;  %v316_v57 = vld [vmem:[#allocation8 + $0x40] sm:$0xff] }
  0x3f   :  { %290 = vmatpush.msrb.mxu1 %v168_v12  ;;  %348 = vmatpush.msrb.mxu2 %v334_v25  ;;  %v317_v58 = vld [vmem:[#allocation8 + $0x48] sm:$0xff]  ;;  %v314_v59 = vld [vmem:[#allocation8 + $0x30] sm:$0xff]  ;;  %v315_v60 = vld [vmem:[#allocation8 + $0x38] sm:$0xff] }
  0x40   :  { %271 = vmatpush.msrb.mxu0 %v134_v14  ;;  %368 = vmatpush.msrb.mxu3 %v335_v28  ;;  %v312_v61 = vld [vmem:[#allocation8 + $0x20] sm:$0xff]  ;;  %v313_v62 = vld [vmem:[#allocation8 + $0x28] sm:$0xff]  ;;  %v310_v63 = vld [vmem:[#allocation8 + $0x10] sm:$0xff] }
  0x41   :  { %291 = vmatpush.msrb.mxu1 %v166_v15  ;;  %349 = vmatpush.msrb.mxu2 %v332_v29  ;;  %v311_v0 = vld [vmem:[#allocation8 + $0x18] sm:$0xff]  ;;  %v308_v1 = vld [vmem:[#allocation8] sm:$0xff]  ;;  %v309_v2 = vld [vmem:[#allocation8 + $0x8] sm:$0xff] }
  0x42   :  { %272 = vmatpush.msrb.mxu0 %v132_v18  ;;  %369 = vmatpush.msrb.mxu3 %v333_v32  ;;  %v340_v21 = vld [vmem:[%s613_s4] sm:$0x3] }
  0x43   :  { %292 = vmatpush.msrb.mxu1 %v164_v19  ;;  %350 = vmatpush.msrb.mxu2 %v330_v33 }
  0x44   :  { %273 = vmatpush.msrb.mxu0 %v130_v22  ;;  %370 = vmatpush.msrb.mxu3 %v331_v36  ;;  %v342_v22 = vperm.slane %v340_v21, 0 }
  0x45   :  { %293 = vmatpush.msrb.mxu1 %v162_v23  ;;  %351 = vmatpush.msrb.mxu2 %v328_v37  ;;  %v343_v23 = vperm.slane %v340_v21, 1 }
  0x46   :  { %274 = vmatpush.msrb.mxu0 %v128_v26  ;;  %371 = vmatpush.msrb.mxu3 %v329_v40 }
  0x47   :  { %294 = vmatpush.msrb.mxu1 %v160_v27  ;;  %352 = vmatpush.msrb.mxu2 %v326_v41 }
  0x48   :  { %275 = vmatpush.msrb.mxu0 %v126_v30  ;;  %372 = vmatpush.msrb.mxu3 %v327_v44 }
  0x49   :  { %295 = vmatpush.msrb.mxu1 %v158_v31  ;;  %353 = vmatpush.msrb.mxu2 %v324_v49 }
  0x4a   :  { %276 = vmatpush.msrb.mxu0 %v124_v34  ;;  %373 = vmatpush.msrb.mxu3 %v325_v50 }
  0x4b   :  { %296 = vmatpush.msrb.mxu1 %v156_v35  ;;  %354 = vmatpush.msrb.mxu2 %v322_v51 }
  0x4c   :  { %277 = vmatpush.msrb.mxu0 %v122_v38  ;;  %374 = vmatpush.msrb.mxu3 %v323_v52 }
  0x4d   :  { %297 = vmatpush.msrb.mxu1 %v154_v39  ;;  %355 = vmatpush.msrb.mxu2 %v320_v53 }
  0x4e   :  { %278 = vmatpush.msrb.mxu0 %v120_v42  ;;  %375 = vmatpush.msrb.mxu3 %v321_v54 }
  0x4f   :  { %298 = vmatpush.msrb.mxu1 %v152_v43  ;;  %356 = vmatpush.msrb.mxu2 %v318_v55 }
  0x50   :  { %279 = vmatpush.msrb.mxu0 %v118_v45  ;;  %376 = vmatpush.msrb.mxu3 %v319_v56 }
  0x51   :  { %299 = vmatpush.msrb.mxu1 %v150_v46  ;;  %357 = vmatpush.msrb.mxu2 %v316_v57 }
  0x52   :  { %280 = vmatpush.msrb.mxu0 %v116_v47  ;;  %377 = vmatpush.msrb.mxu3 %v317_v58 }
  0x53   :  { %300 = vmatpush.msrb.mxu1 %v148_v48  ;;  %281 = vmatmul.f32.vlgmr.msrb.gmra.mxu0 %v598_v16 }
  0x54   :  { %301 = vmatmul.f32.vlgmr.msrb.gmra.mxu1 %v595_v9  ;;  %358 = vmatpush.msrb.mxu2 %v314_v59 }
  0x55   :  { %378 = vmatpush.msrb.mxu3 %v315_v60 }
  0x56   :  { %359 = vmatpush.msrb.mxu2 %v312_v61 }
  0x57   :  { %379 = vmatpush.msrb.mxu3 %v313_v62 }
  0x58   :  { %360 = vmatpush.msrb.mxu2 %v310_v63 }
  0x59   :  { %380 = vmatpush.msrb.mxu3 %v311_v0 }
  0x5a   :  { %361 = vmatpush.msrb.mxu2 %v308_v1 }
  0x5b   :  { %381 = vmatpush.msrb.mxu3 %v309_v2 }
  0xb2   :  { %v202_v5 = vpop.f32.mrf.mxu0 }
  0xb3   :  { %v203_v7 = vadd.f32 %v202_v5, %v181_v4 }
  0xb7   :  { %v222_v6 = vpop.f32.mrf.mxu1 }
  0xb8   :  { %v223_v10 = vadd.f32 %v222_v6, %v203_v7 }
  0xba   :  { %v262_v9 = vpop.f32.mrf.mxu3 }
  0xbb   :  { %v263_v11 = vadd.f32 %v262_v9, %v182_v8 }
  0xbc   :  { %v242_v12 = vpop.f32.mrf.mxu2 }
  0xbd   :  { %v243_v15 = vadd.f32 %v242_v12, %v223_v10 }
  0xbf   :  { %v305_v18 = vmax.f32 %v243_v15, 0.0 }
  0xd0   :  { %v282_v13 = vpop.f32.mrf.mxu0 }
  0xd1   :  { %v302_v14 = vpop.f32.mrf.mxu1  ;;  %v283_v16 = vadd.f32 %v282_v13, %v263_v11 }
  0xd3   :  { %v303_v17 = vadd.f32 %v302_v14, %v283_v16 }
  0xd5   :  { %v306_v19 = vmax.f32 %v303_v17, 0.0 }
  0xd7   :  { %v307_v20 = vadd.f32 %v306_v19, %v305_v18 }
  0xd9   :  { %362 = vmatmul.f32.vlgmr.msrb.gmra.mxu2 %v307_v20  ;;  %382 = vmatmul.f32.vlgmr.msrb.gmra.mxu3 %v307_v20 }
 0x15c   :  { %v363_v24 = vpop.f32.mrf.mxu2  ;;  %v383_v25 = vpop.f32.mrf.mxu3 }
 0x15d   :  { %v364_v26 = vadd.f32 %v363_v24, %v342_v22  ;;  %v384_v27 = vadd.f32 %v383_v25, %v343_v23 }
 0x15f   :  { %386 = vst [vmem:[#allocation10] sm:$0xff] %v364_v26  ;;  %v387_v28 = vmul.f32 1.442695, %v384_v27 }
 0x161   :  { %416 = vpow2.f32 %v387_v28 }
 0x167   :  { %v417_v29 = vpop.eup %416 }
 0x168   :  { %389 = vst [vmem:[#allocation10 + $0x8] sm:$0xff] %v417_v29 }
 0x169   :  { %400 = dma.vmem_to_hbm [thread:$0]  %s396_s14, 256, %s398_s17, [#allocation4]  }
 0x16a   :  { %544 = dma.done.wait [#allocation4], 256  }
 0x16b   :  { %545 = vsyncadd [#allocation4], 4294967040 }
 0x16c   :  { %405 = vsyncpa [#allocation3], 1 }
 0x16d   :  { %406 = vsyncpa [#allocation6], 1 }
 0x16e   :  { %407 = vsyncpa [#allocation9], 1 }
 0x16f   :  { %408 = vsyncpa [#allocation4], 1 }

</bundles_post_ra>
